<compile_context>
chip_gen: v5e
topology: v5e:2x2
jax: 0.10.0
libtpu: 0.0.40
codegen_flags: <defaults>
</compile_context>

<pallas_src>
import jax
import jax.numpy as jnp
from jax.experimental import pallas as pl
from jax.experimental.pallas import tpu as pltpu  # noqa: F401  (TPU backend)


def _identity_kernel(x_ref, o_ref):
    # Identity forward pass: o = x (single full-tile copy).
    o_ref[...] = x_ref[...]


def prot_bert_embedding_forward(x):
    """Pallas implementation of protBertEmbedding.forward (identity)."""
    orig_shape = x.shape
    total = int(x.size)

    # Lane-dense single block: flatten to (1, total) so the last (lane) dim is
    # >= 128 and the whole tensor is one full-extent block (grid collapsed).
    x2d = x.reshape(1, total)

    out2d = pl.pallas_call(
        _identity_kernel,
        out_shape=jax.ShapeDtypeStruct((1, total), x.dtype),
        # Full-extent block == array shape, so no (8,128) padding issues and
        # no grid loop at all (grid = ()).
        in_specs=[pl.BlockSpec((1, total), lambda: (0, 0))],
        out_specs=pl.BlockSpec((1, total), lambda: (0, 0)),
        # Alias output to input buffer: identity needs no new HBM result
        # buffer and no extra HBM round-trip.
        input_output_aliases={0: 0},
    )(x2d)

    return out2d.reshape(orig_shape)


if __name__ == "__main__":
    key = jax.random.PRNGKey(0)
    # batch=2, peptideSize=33 (module default), embed_dim=32
    x = jax.random.normal(key, (2, 33, 32), dtype=jnp.float32)

    out = prot_bert_embedding_forward(x)
    out = jax.block_until_ready(out)

    assert out.shape == x.shape, (out.shape, x.shape)
    assert out.dtype == x.dtype
    assert bool(jnp.allclose(out, x)), "identity kernel mismatch"

    print("KERNEL_OK")
</pallas_src>

<mosaic_0001>
module attributes {stable_mosaic.version = 11 : i64} {
  func.func @_identity_kernel(%arg0: memref<1x2112xf32, #tpu.memory_space<vmem>>, %arg1: memref<1x2112xf32, #tpu.memory_space<vmem>>) attributes {dimension_semantics = [], scalar_prefetch = 0 : i64, scratch_operands = 0 : i64, tpu.core_type = #tpu.core_type<tc>} {
    %c0 = arith.constant 0 : index
    %c0_0 = arith.constant 0 : index
    %0 = vector.load %arg0[%c0, %c0_0] : memref<1x2112xf32, #tpu.memory_space<vmem>>, vector<1x2112xf32>
    %c0_1 = arith.constant 0 : index
    %c0_2 = arith.constant 0 : index
    %1 = vector.load %arg1[%c0_1, %c0_2] : memref<1x2112xf32, #tpu.memory_space<vmem>>, vector<1x2112xf32>
    tpu.vector_store %arg1[%c0_1, %c0_2], %0 {strides = array<i32>} : memref<1x2112xf32, #tpu.memory_space<vmem>>, vector<1x2112xf32>,
    return
  }
}

</mosaic_0001>

<bundles_post_ra>
// kernel: tpu_custom_call.1
= control target key start
LH: loop header
LB: loop body
LE: loop exit
PB: predicated region body
PF: predicated region fallthrough
CT: control target
= control target key end

     0   :  { %6 = vsyncpa [#allocation3], 0  ;;  %s122_s0 = inlined_call_operand.hbm [shape: f32[1,2112], index: 0, kind: input, shape index: {}, may-alias: {0,1}]   ;;  %s123_s1 = inlined_call_operand.hbm [shape: f32[1,2112], index: 1, kind: output, shape index: {}, may-alias: {0,1}]  }
   0x1   :  { %7 = vsyncpa [#allocation4], 0  ;;  %s13_s8 = sshll.u32 %s122_s0, 4  ;;  %s104_s9 = smov [#allocation2]   ;;  %s14_s8 = int_to_ptr.hbm [resolvable:$true] %s13_s8 }
   0x2   :  { %s15_s10 = sshll.u32 %s104_s9, 4  ;;  %s16_s10 = int_to_ptr.vmem [resolvable:$true] %s15_s10 }
   0x3   :  { %18 = dma.hbm_to_vmem [thread:$0]  %s14_s8, 272, %s16_s10, [#allocation3]  }
   0x4   :  { %100 = dma.done.wait [#allocation3], 272  }
   0x5   :  { %101 = vsyncadd [#allocation3], 4294967024  ;;  %v28_v0 = vlaneseq  ;;  %s105_s11 = smov [#allocation5]   ;;  %s40_s15 = sshll.u32 %s123_s1, 4  ;;  %v23_v1 = vld [vmem:[#allocation2] sm:$0xff]  ;;  %v24_v2 = vld [vmem:[#allocation2 + $0x8] sm:$0xff]  ;;  %s41_s15 = int_to_ptr.hbm [resolvable:$true] %s40_s15 }
   0x6   :  { %s38_s12 = sshll.u32 %s105_s11, 4  ;;  %v25_v3 = vld [vmem:[#allocation2 + $0x10] sm:$0x1]  ;;  %26 = vst [vmem:[#allocation5] sm:$0xff] %v23_v1  ;;  %s39_s12 = int_to_ptr.vmem [resolvable:$true] %s38_s12 }
   0x7   :  { %vm30_vm0 = vcmp.lt.s32.totalorder %v28_v0, 64  ;;  %27 = vst [vmem:[#allocation5 + $0x8] sm:$0xff] %v24_v2 }
   0x8   :  { %32 = vst.msk [vmem:[#allocation5 + $0x10] sm:$0x1] %vm30_vm0, %v25_v3 }
   0x9   :  { %43 = dma.vmem_to_hbm [thread:$0]  %s39_s12, 272, %s41_s15, [#allocation4]  }
   0xa   :  { %102 = dma.done.wait [#allocation4], 272  }
   0xb   :  { %103 = vsyncadd [#allocation4], 4294967024 }
   0xc   :  { %48 = vsyncpa [#allocation3], 1 }
   0xd   :  { %49 = vsyncpa [#allocation4], 1 }

</bundles_post_ra>
